<compile_context>
chip_gen: v5e
topology: v5e:2x2
jax: 0.10.0
libtpu: 0.0.40
codegen_flags: <defaults>
</compile_context>

<pallas_src>
import functools

import jax
import jax.numpy as jnp
from jax.experimental import pallas as pl
from jax.experimental.pallas import tpu as pltpu

ALPHA = 1.0
GAMMA = 2  # hard-wired: (1-pt)**2 implemented as an exact square


def _choose_tile_n(n, c, itemsize):
    """Rows per block: big enough to amortize per-step overhead, small enough that
    double-buffered logits blocks stay well under scoped VMEM (incl. v7x 32 MiB)."""
    budget_bytes = 8 * 1024 * 1024                    # per input buffer
    t = budget_bytes // max(1, c * itemsize)
    t = min(1024, t)
    t = max(16, (t // 16) * 16)                       # sublane-friendly (f32:8, bf16:16)
    if n <= t:
        return n                                       # single block == full dim (always legal)
    return t


def focal_loss_kernel(logits_ref, targets_ref, out_ref, acc_ref, *,
                      n_total, tile_n, alpha):
    i = pl.program_id(0)

    @pl.when(i == 0)
    def _init():
        acc_ref[...] = jnp.zeros_like(acc_ref)

    logits = logits_ref[...].astype(jnp.float32)       # (T, C), f32 math even for bf16 in
    tgt = targets_ref[...]                              # (T, 1) int32

    # Numerically-stable row-wise logsumexp.
    row_max = jnp.max(logits, axis=-1, keepdims=True)                               # (T, 1)
    shifted = logits - row_max
    lse = jnp.log(jnp.sum(jnp.exp(shifted), axis=-1, keepdims=True)) + row_max      # (T, 1)

    # Gather the target logit via a one-hot mask (VPU friendly, no dynamic gather).
    cls_ids = jax.lax.broadcasted_iota(jnp.int32, logits.shape, 1)                  # (T, C)
    onehot = (cls_ids == tgt).astype(jnp.float32)                                   # (T, C)
    target_logit = jnp.sum(logits * onehot, axis=-1, keepdims=True)                 # (T, 1)

    ce = jnp.maximum(lse - target_logit, 0.0)           # clamp FP-negative CE
    pt = jnp.exp(-ce)
    omp = 1.0 - pt
    focal = (omp * omp) * ce                            # gamma=2 -> exact square (no pow)
    if alpha != 1.0:
        focal = alpha * focal

    # Mask padded rows of the (possibly partial) last tile out of the reduction.
    row_ids = i * tile_n + jax.lax.broadcasted_iota(jnp.int32, focal.shape, 0)
    focal = jnp.where(row_ids < n_total, focal, 0.0)

    acc_ref[...] += jnp.sum(focal, keepdims=True)       # (1, 1) running sum

    @pl.when(i == pl.num_programs(0) - 1)
    def _finalize():
        # reduction='mean': divide by the true total N, single store.
        out_ref[...] = acc_ref[...] * (1.0 / n_total)


def focal_loss(logits, targets, *, alpha=ALPHA, tile_n=None):
    """logits: (N, C) float32/bfloat16; targets: (N,) int. Returns scalar f32 mean focal loss."""
    n, c = logits.shape
    targets2d = targets.astype(jnp.int32).reshape(n, 1)

    if tile_n is None:
        tile_n = _choose_tile_n(n, c, jnp.dtype(logits.dtype).itemsize)
    grid_n = pl.cdiv(n, tile_n)

    kernel = functools.partial(
        focal_loss_kernel, n_total=n, tile_n=tile_n, alpha=float(alpha))

    out = pl.pallas_call(
        kernel,
        out_shape=jax.ShapeDtypeStruct((1, 1), jnp.float32),
        grid=(grid_n,),
        in_specs=[
            pl.BlockSpec((tile_n, c), lambda i: (i, 0)),   # full C per block
            pl.BlockSpec((tile_n, 1), lambda i: (i, 0)),
        ],
        # Resident output across the reduction axis; written once at the last step.
        out_specs=pl.BlockSpec((1, 1), lambda i: (0, 0)),
        scratch_shapes=[pltpu.VMEM((1, 1), jnp.float32)],
        compiler_params=pltpu.CompilerParams(
            dimension_semantics=("arbitrary",),            # reduction axis
        ),
    )(logits, targets2d)
    return out[0, 0]


def focal_loss_ref(logits, targets, *, alpha=ALPHA):
    """Plain-JAX reference mirroring the PyTorch module (weight=None, mean)."""
    logp = jax.nn.log_softmax(logits.astype(jnp.float32), axis=-1)
    ce = -jnp.take_along_axis(logp, targets[:, None].astype(jnp.int32), axis=-1)[:, 0]
    pt = jnp.exp(-ce)
    f = alpha * (1.0 - pt) ** 2 * ce
    return jnp.mean(f)


if __name__ == "__main__":
    key = jax.random.PRNGKey(0)
    k1, k2, k3, k4 = jax.random.split(key, 4)

    # 1) Small shape consistent with the module's use (6-class classifier logits).
    N, C = 8, 6
    logits = jax.random.normal(k1, (N, C), dtype=jnp.float32)
    targets = jax.random.randint(k2, (N,), 0, C, dtype=jnp.int32)
    out = jax.block_until_ready(focal_loss(logits, targets))
    ref = jax.block_until_ready(focal_loss_ref(logits, targets))
    assert jnp.allclose(out, ref, rtol=1e-5, atol=1e-6), (out, ref)

    # 2) Multi-tile path: partial last tile (masking) + bf16 inputs, forced small tile.
    N2, C2 = 300, 6
    logits2 = jax.random.normal(k3, (N2, C2), dtype=jnp.float32).astype(jnp.bfloat16)
    targets2 = jax.random.randint(k4, (N2,), 0, C2, dtype=jnp.int32)
    out2 = jax.block_until_ready(focal_loss(logits2, targets2, tile_n=128))
    ref2 = jax.block_until_ready(focal_loss_ref(logits2.astype(jnp.float32), targets2))
    assert jnp.allclose(out2, ref2, rtol=1e-5, atol=1e-5), (out2, ref2)

    print("KERNEL_OK")
</pallas_src>

<mosaic_0001>
module attributes {stable_mosaic.version = 11 : i64} {
  func.func @focal_loss_kernel(%arg0: i32, %arg1: memref<8x6xf32, #tpu.memory_space<vmem>>, %arg2: memref<8x1xi32, #tpu.memory_space<vmem>>, %arg3: memref<1x1xf32, #tpu.memory_space<vmem>>, %arg4: memref<1x1xf32, #tpu.memory_space<vmem>>) attributes {dimension_semantics = [#tpu.dimension_semantics<arbitrary>], iteration_bounds = array<i64: 1>, scalar_prefetch = 0 : i64, scratch_operands = 1 : i64, tpu.core_type = #tpu.core_type<tc>, window_params = [{transform_indices = @transform_0, window_bounds = array<i64: 8, 6>}, {transform_indices = @transform_1, window_bounds = array<i64: 8, 1>}, {pipeline_mode = #tpu.pipeline_mode<synchronous>, transform_indices = @transform_2, window_bounds = array<i64: 1, 1>}]} {
    %c0_i32 = arith.constant 0 : i32
    %0 = arith.cmpi eq, %arg0, %c0_i32 : i32
    %1 = arith.extui %0 : i1 to i32
    %c0_i32_0 = arith.constant 0 : i32
    %2 = arith.cmpi ne, %1, %c0_i32_0 : i32
    scf.if %2 {
      %cst_18 = arith.constant 0.000000e+00 : f32
      %51 = vector.broadcast %cst_18 : f32 to vector<1x1xf32>
      %c0_19 = arith.constant 0 : index
      %c0_20 = arith.constant 0 : index
      %52 = vector.load %arg4[%c0_19, %c0_20] : memref<1x1xf32, #tpu.memory_space<vmem>>, vector<1x1xf32>
      tpu.vector_store %arg4[%c0_19, %c0_20], %51 {strides = array<i32>} : memref<1x1xf32, #tpu.memory_space<vmem>>, vector<1x1xf32>,
    } else {
    }
    %c0 = arith.constant 0 : index
    %c0_1 = arith.constant 0 : index
    %3 = vector.load %arg1[%c0, %c0_1] : memref<8x6xf32, #tpu.memory_space<vmem>>, vector<8x6xf32>
    %c0_2 = arith.constant 0 : index
    %c0_3 = arith.constant 0 : index
    %4 = vector.load %arg2[%c0_2, %c0_3] : memref<8x1xi32, #tpu.memory_space<vmem>>, vector<8x1xi32>
    %cst = arith.constant dense<0xFF800000> : vector<8xf32>
    %5 = vector.multi_reduction <maximumf>, %3, %cst [1] : vector<8x6xf32> to vector<8xf32>
    %6 = vector.shape_cast %5 : vector<8xf32> to vector<8x1xf32>
    %7 = vector.broadcast %6 : vector<8x1xf32> to vector<8x6xf32>
    %8 = arith.subf %3, %7 : vector<8x6xf32>
    %9 = math.exp %8 : vector<8x6xf32>
    %cst_4 = arith.constant dense<0.000000e+00> : vector<8xf32>
    %10 = vector.multi_reduction <add>, %9, %cst_4 [1] : vector<8x6xf32> to vector<8xf32>
    %11 = vector.shape_cast %10 : vector<8xf32> to vector<8x1xf32>
    %12 = math.log %11 : vector<8x1xf32>
    %13 = arith.addf %12, %6 : vector<8x1xf32>
    %14 = tpu.iota {dimensions = array<i32: 1>} : vector<8x6xi32>
    %15 = vector.broadcast %4 : vector<8x1xi32> to vector<8x6xi32>
    %16 = arith.cmpi eq, %14, %15 : vector<8x6xi32>
    %17 = arith.extui %16 : vector<8x6xi1> to vector<8x6xi32>
    %18 = arith.sitofp %17 : vector<8x6xi32> to vector<8x6xf32>
    %19 = arith.mulf %3, %18 : vector<8x6xf32>
    %cst_5 = arith.constant dense<0.000000e+00> : vector<8xf32>
    %20 = vector.multi_reduction <add>, %19, %cst_5 [1] : vector<8x6xf32> to vector<8xf32>
    %21 = vector.shape_cast %20 : vector<8xf32> to vector<8x1xf32>
    %22 = arith.subf %13, %21 : vector<8x1xf32>
    %cst_6 = arith.constant 0.000000e+00 : f32
    %23 = vector.broadcast %cst_6 : f32 to vector<8x1xf32>
    %24 = arith.maximumf %22, %23 : vector<8x1xf32>
    %cst_7 = arith.constant 0.000000e+00 : f32
    %25 = vector.broadcast %cst_7 : f32 to vector<8x1xf32>
    %26 = arith.subf %25, %24 : vector<8x1xf32>
    %27 = math.exp %26 : vector<8x1xf32>
    %cst_8 = arith.constant 1.000000e+00 : f32
    %28 = vector.broadcast %cst_8 : f32 to vector<8x1xf32>
    %29 = arith.subf %28, %27 : vector<8x1xf32>
    %30 = arith.mulf %29, %29 : vector<8x1xf32>
    %31 = arith.mulf %30, %24 : vector<8x1xf32>
    %c8_i32 = arith.constant 8 : i32
    %32 = arith.muli %arg0, %c8_i32 : i32
    %33 = tpu.iota {dimensions = array<i32: 0>} : vector<8x1xi32>
    %34 = vector.broadcast %32 : i32 to vector<8x1xi32>
    %35 = arith.addi %34, %33 : vector<8x1xi32>
    %c8_i32_9 = arith.constant 8 : i32
    %36 = vector.broadcast %c8_i32_9 : i32 to vector<8x1xi32>
    %37 = arith.cmpi slt, %35, %36 : vector<8x1xi32>
    %cst_10 = arith.constant 0.000000e+00 : f32
    %38 = vector.broadcast %cst_10 : f32 to vector<8x1xf32>
    %39 = arith.select %37, %31, %38 : vector<8x1xi1>, vector<8x1xf32>
    %c0_11 = arith.constant 0 : index
    %c0_12 = arith.constant 0 : index
    %40 = vector.load %arg4[%c0_11, %c0_12] : memref<1x1xf32, #tpu.memory_space<vmem>>, vector<1x1xf32>
    %41 = vector.shape_cast %39 : vector<8x1xf32> to vector<1x8x1xf32>
    %cst_13 = arith.constant dense<0.000000e+00> : vector<1xf32>
    %42 = vector.multi_reduction <add>, %41, %cst_13 [1, 2] : vector<1x8x1xf32> to vector<1xf32>
    %43 = vector.shape_cast %42 : vector<1xf32> to vector<1x1x1xf32>
    %44 = vector.extract %43[0, 0, 0] : f32 from vector<1x1x1xf32>
    %45 = vector.broadcast %44 : f32 to vector<1x1xf32>
    %46 = arith.addf %40, %45 : vector<1x1xf32>
    %c0_14 = arith.constant 0 : index
    %c0_15 = arith.constant 0 : index
    %47 = vector.load %arg4[%c0_14, %c0_15] : memref<1x1xf32, #tpu.memory_space<vmem>>, vector<1x1xf32>
    tpu.vector_store %arg4[%c0_14, %c0_15], %46 {strides = array<i32>} : memref<1x1xf32, #tpu.memory_space<vmem>>, vector<1x1xf32>,
    %c0_i32_16 = arith.constant 0 : i32
    %48 = arith.cmpi eq, %arg0, %c0_i32_16 : i32
    %49 = arith.extui %48 : i1 to i32
    %c0_i32_17 = arith.constant 0 : i32
    %50 = arith.cmpi ne, %49, %c0_i32_17 : i32
    scf.if %50 {
      %c0_18 = arith.constant 0 : index
      %c0_19 = arith.constant 0 : index
      %51 = vector.load %arg4[%c0_18, %c0_19] : memref<1x1xf32, #tpu.memory_space<vmem>>, vector<1x1xf32>
      %cst_20 = arith.constant 1.250000e-01 : f32
      %52 = vector.broadcast %cst_20 : f32 to vector<1x1xf32>
      %53 = arith.mulf %51, %52 : vector<1x1xf32>
      %c0_21 = arith.constant 0 : index
      %c0_22 = arith.constant 0 : index
      %54 = vector.load %arg3[%c0_21, %c0_22] : memref<1x1xf32, #tpu.memory_space<vmem>>, vector<1x1xf32>
      tpu.vector_store %arg3[%c0_21, %c0_22], %53 {strides = array<i32>} : memref<1x1xf32, #tpu.memory_space<vmem>>, vector<1x1xf32>,
    } else {
    }
    return
  }
  func.func @transform_0(%arg0: i32) -> (i32, i32) {
    %c0_i32 = arith.constant 0 : i32
    %c0_i32_0 = arith.constant 0 : i32
    return %arg0, %c0_i32 : i32, i32
  }
  func.func @transform_1(%arg0: i32) -> (i32, i32) {
    %c0_i32 = arith.constant 0 : i32
    %c0_i32_0 = arith.constant 0 : i32
    return %arg0, %c0_i32 : i32, i32
  }
  func.func @transform_2(%arg0: i32) -> (i32, i32) {
    %c0_i32 = arith.constant 0 : i32
    %c0_i32_0 = arith.constant 0 : i32
    %c0_i32_1 = arith.constant 0 : i32
    return %c0_i32, %c0_i32_0 : i32, i32
  }
}

</mosaic_0001>

<bundles_post_ra>
// kernel: tpu_custom_call.1
= control target key start
LH: loop header
LB: loop body
LE: loop exit
PB: predicated region body
PF: predicated region fallthrough
CT: control target
= control target key end

     0   :  { %vm20_vm0 = vcmask 48128   ;;  %s170_s0 = inlined_call_operand.vmem [shape: f32[8,6], index: 0, kind: input, shape index: {}]   ;;  %s171_s1 = inlined_call_operand.vmem [shape: s32[8,1], index: 1, kind: input, shape index: {}]   ;;  %s172_s2 = inlined_call_operand.hbm [shape: f32[1,1], index: 2, kind: output, shape index: {}]  }
   0x1   :  { %v18_v0 = vld [vmem:[%s170_s0] sm:$0xff] }
   0x2   :  { %7 = vsyncpa [#allocation4], 0  ;;  %v21_v1 = vsel %vm20_vm0, %v18_v0, -inf  ;;  %v137_v2 = vmov 0   ;;  %v19_v3 = vld [vmem:[%s171_s1] sm:$0xff]  ;;  %vm16_vm1 = vcmask 0   ;;  %v33_v10 = vlaneseq }
   0x3   :  { %104 = vset.pattern.permute.xlu0 %v137_v2  ;;  %v138_v4 = vmov 0.0   ;;  %vm61_vm3 = vcmask 7168   ;;  %s139_s1 = smov [#allocation3]   ;;  %s89_s16 = sshll.u32 %s172_s2, 4  ;;  %s90_s16 = int_to_ptr.hbm [resolvable:$true] %s89_s16 }
   0x4   :  { %22 = vmax.xlane.f32.xlu0 %v21_v1  ;;  %17 = vst.msk [vmem:[#allocation2] sm:$0x1] %vm16_vm1, %v138_v4  ;;  %v34_v11 = vand.u32 127, %v33_v10  ;;  %s87_s13 = sshll.u32 %s139_s1, 4  ;;  %s88_s13 = int_to_ptr.vmem [resolvable:$true] %s87_s13 }
   0xb   :  { %v60_v37 = vld [vmem:[#allocation2] sm:$0x1] }
  0x18   :  { %36 = vperm.xlu0 %104, %v19_v3  }
  0x77   :  { %v23_v5 = vpop.xlane.xlu0 %22 }
  0x78   :  { %v24_v6 = vsub.f32 %v18_v0, %v23_v5 }
  0x7a   :  { %v25_v7 = vmul.f32 1.442695, %v24_v6 }
  0x7c   :  { %105 = vpow2.f32 %v25_v7 }
  0x82   :  { %v106_v8 = vpop.eup %105 }
  0x83   :  { %v27_v9 = vsel %vm20_vm0, %v106_v8, 0.0 }
  0x84   :  { %28 = vadd.xlane.f32.xlu1 %v27_v9 }
  0x8a   :  { %v37_v12 = vpop.permute.xlu0 %36 }
  0x8b   :  { %vm38_vm2 = vcmp.eq.s32.totalorder %v34_v11, %v37_v12 }
  0x8c   :  { %v98_v13 = vsel %vm38_vm2, 1.0, %v138_v4 }
  0x8d   :  { %v41_v14 = vmul.f32 %v98_v13, %v18_v0 }
  0x8f   :  { %v42_v15 = vsel %vm20_vm0, %v41_v14, 0.0 }
  0x90   :  { %43 = vadd.xlane.f32.xlu1 %v42_v15 }
  0xf7   :  { %v29_v16 = vpop.xlane.xlu1 %28 }
  0xf8   :  { %107 = vlog2.f32 %v29_v16 }
  0xfe   :  { %v108_v17 = vpop.eup %107 }
  0xff   :  { %v31_v18 = vmul.f32 0.6931472, %v108_v17 }
 0x101   :  { %v32_v19 = vadd.f32 %v31_v18, %v23_v5 }
 0x103   :  { %v44_v20 = vpop.xlane.xlu1 %43 }
 0x104   :  { %v45_v21 = vsub.f32 %v32_v19, %v44_v20 }
 0x106   :  { %v46_v22 = vmax.f32 %v45_v21, 0.0 }
 0x108   :  { %v47_v23 = vsub.f32 0.0, %v46_v22 }
 0x10a   :  { %v48_v24 = vmul.f32 1.442695, %v47_v23 }
 0x10c   :  { %109 = vpow2.f32 %v48_v24 }
 0x112   :  { %v110_v25 = vpop.eup %109 }
 0x113   :  { %v50_v26 = vsub.f32 1.0, %v110_v25 }
 0x115   :  { %v51_v27 = vmul.f32 %v50_v26, %v50_v26 }
 0x117   :  { %v52_v28 = vmul.f32 %v51_v27, %v46_v22 }
 0x119   :  { %v62_v29 = vsel %vm61_vm3, %v52_v28, 0.0 }
 0x11a   :  { %63 = vadd.xlane.f32.xlu2 %v62_v29 }
 0x18d   :  { %v64_v30 = vpop.xlane.xlu2 %63 }
 0x18e   :  { %v65_v31 = vrot.slane %v64_v30, 4 }
 0x190   :  { %v66_v32 = vadd.f32 %v65_v31, %v64_v30 }
 0x192   :  { %v67_v33 = vrot.slane %v66_v32, 2 }
 0x194   :  { %v68_v34 = vadd.f32 %v67_v33, %v66_v32 }
 0x196   :  { %v69_v35 = vrot.slane %v68_v34, 1 }
 0x198   :  { %v70_v36 = vadd.f32 %v69_v35, %v68_v34 }
 0x19a   :  { %99 = vpush %v70_v36 }
 0x1cb   :  { %s100_s0 = spop %99 }
 0x1cc   :  { %v72_v38 = vstv %s100_s0 }
 0x1cd   :  { %v73_v39 = vadd.f32 %v72_v38, %v60_v37 }
 0x1cf   :  { %75 = vst.msk [vmem:[#allocation2] sm:$0x1] %vm16_vm1, %v73_v39 }
 0x1d6   :  { %v79_v40 = vld [vmem:[#allocation2] sm:$0x1] }
 0x1d7   :  { %v80_v41 = vmul.f32 0.125, %v79_v40 }
 0x1d9   :  { %81 = vst.msk [vmem:[#allocation3] sm:$0x1] %vm16_vm1, %v80_v41 }
 0x1da   :  { %92 = dma.vmem_to_hbm [thread:$0]  %s88_s13, 16, %s90_s16, [#allocation4]  }
 0x1db   :  { %135 = dma.done.wait [#allocation4], 16  }
 0x1dc   :  { %136 = vsyncadd [#allocation4], 4294967280 }
 0x1dd   :  { %97 = vsyncpa [#allocation4], 1 }

</bundles_post_ra>
